<compile_context>
chip_gen: v7x
topology: tpu7x:2x2x1
jax: 0.10.0
libtpu: 0.0.40
codegen_flags: <defaults>
</compile_context>

<pallas_src>
import functools
import math

import jax
import jax.numpy as jnp
from jax.experimental import pallas as pl
from jax.experimental.pallas import tpu as pltpu


def _dice_partial_kernel(in_ref, tgt_ref, out_ref, inter_acc, sum_acc, *,
                         d_cols, tile_d, tiles_per_chunk, num_tiles, mask_tail):
    """Accumulates per-row intersection and (input + target) sums.

    Grid: (p_chunks, row_tiles, feature_tiles). The feature axis (innermost)
    is the reduction axis; accumulation happens in two full-width f32 VMEM
    scratch buffers (pure dense VPU adds per step) and the single cross-lane
    reduction happens once in the epilogue.
    """
    k = pl.program_id(2)

    @pl.when(k == 0)
    def _():
        inter_acc[...] = jnp.zeros_like(inter_acc)
        sum_acc[...] = jnp.zeros_like(sum_acc)

    # Stream native dtype from HBM; accumulate in f32.
    x = in_ref[...].astype(jnp.float32)
    t = tgt_ref[...].astype(jnp.float32)

    if mask_tail:
        # Only the single ragged feature tile pays for the mask; every full
        # tile takes the dense unmasked path.
        gidx = pl.program_id(0) * tiles_per_chunk + k
        is_tail = gidx == (num_tiles - 1)

        @pl.when(is_tail)
        def _():
            col = gidx * tile_d + jax.lax.broadcasted_iota(jnp.int32, x.shape, 1)
            valid = col < d_cols
            xm = jnp.where(valid, x, 0.0)
            tm = jnp.where(valid, t, 0.0)
            inter_acc[...] += xm * tm
            sum_acc[...] += xm + tm

        @pl.when(jnp.logical_not(is_tail))
        def _():
            inter_acc[...] += x * t
            sum_acc[...] += x + t
    else:
        inter_acc[...] += x * t
        sum_acc[...] += x + t

    @pl.when(k == pl.num_programs(2) - 1)
    def _():
        # Single cross-lane reduction per (chunk, row-tile), epilogue only.
        out_ref[0, 0, :, :] = jnp.sum(inter_acc[...], axis=1, keepdims=True)
        out_ref[0, 1, :, :] = jnp.sum(sum_acc[...], axis=1, keepdims=True)


def _vmem_capacity_bytes():
    try:
        cap = int(pltpu.get_tpu_info().vmem_capacity_bytes)
        if cap > 0:
            return cap
    except Exception:
        pass
    return 64 * 1024 * 1024  # conservative default (v7x per-TC VMEM)


def _num_tensorcores():
    # Only v7x exposes 2 TensorCores per chip to Pallas; v5e/v6e have 1.
    try:
        kind = jax.devices()[0].device_kind.lower()
        if "v7" in kind or "7x" in kind:
            return 2
    except Exception:
        pass
    return 1


def dice_loss(inp, tgt, *, smooth=1.0):
    assert inp.shape == tgt.shape
    n = inp.shape[0]
    d_total = int(math.prod(inp.shape[1:])) if inp.ndim > 1 else 1
    d_total = max(d_total, 1)

    inp_flat = inp.reshape(n, d_total)
    tgt_flat = tgt.reshape(n, d_total)

    # Fold features into sublanes (largest of 8/4/2 dividing d_total) so small
    # batches still fill the 8-sublane vregs; the reshape stays contiguous.
    fold = 1
    for f in (8, 4, 2):
        if d_total % f == 0:
            fold = f
            break
    rows = n * fold
    d_cols = d_total // fold
    inp2 = inp_flat.reshape(rows, d_cols)
    tgt2 = tgt_flat.reshape(rows, d_cols)

    in_isz = jnp.dtype(inp2.dtype).itemsize
    tg_isz = jnp.dtype(tgt2.dtype).itemsize

    # Generation-aware VMEM budget: ~48 MiB on 128-MiB v5e/v6e, ~40 MiB on
    # 64-MiB v7x, for the double-buffered inputs + the two f32 accumulators.
    vmem_cap = _vmem_capacity_bytes()
    budget = min(48 * 1024 * 1024, (vmem_cap * 5) // 8)

    # Row (sublane) tiling bounds VMEM independent of batch size.
    row_cap = 512
    tile_rows = rows
    if rows > row_cap:
        for cand in range(row_cap, 0, -8):   # multiples of 8 only
            if rows % cand == 0:
                tile_rows = cand
                break

    def vmem_need(tr, td):
        inputs = 2 * tr * td * (in_isz + tg_isz)   # double-buffered input blocks
        scratch = 2 * tr * td * 4                  # two f32 accumulators
        return inputs + scratch

    d128 = pl.cdiv(d_cols, 128) * 128
    tile_d = 32768
    while tile_d > 512 and vmem_need(tile_rows, tile_d) > budget:
        tile_d //= 2
    tile_d = min(tile_d, d128)

    num_tiles = pl.cdiv(d_cols, tile_d)
    num_row_tiles = rows // tile_rows
    mask_tail = (num_tiles * tile_d) != d_cols

    # Split feature tiles across TensorCores only on 2-TC chips (v7x), using
    # CORE_PARALLEL (a plain "parallel" axis does not shard across TCs).
    n_tc = _num_tensorcores()
    p_chunks = 2 if (n_tc >= 2 and num_tiles >= 2 and num_tiles % 2 == 0) else 1
    tiles_per_chunk = num_tiles // p_chunks

    kernel = functools.partial(
        _dice_partial_kernel,
        d_cols=d_cols,
        tile_d=tile_d,
        tiles_per_chunk=tiles_per_chunk,
        num_tiles=num_tiles,
        mask_tail=mask_tail,
    )

    def in_map(p, r, k):
        return (r, p * tiles_per_chunk + k)

    def out_map(p, r, k):
        return (p, 0, r, 0)

    out_shape = jax.ShapeDtypeStruct((p_chunks, 2, rows, 1), jnp.float32)

    need = vmem_need(tile_rows, tile_d)
    vmem_limit = int(min(max(32 * 1024 * 1024, need + 8 * 1024 * 1024),
                         vmem_cap - 4 * 1024 * 1024))

    axis0_sem = pltpu.CORE_PARALLEL if p_chunks == 2 else pltpu.ARBITRARY

    partials = pl.pallas_call(
        kernel,
        out_shape=out_shape,
        grid_spec=pltpu.PrefetchScalarGridSpec(
            num_scalar_prefetch=0,
            grid=(p_chunks, num_row_tiles, tiles_per_chunk),
            in_specs=[
                pl.BlockSpec((tile_rows, tile_d), in_map),
                pl.BlockSpec((tile_rows, tile_d), in_map),
            ],
            out_specs=pl.BlockSpec((1, 2, tile_rows, 1), out_map),
            scratch_shapes=[
                pltpu.VMEM((tile_rows, tile_d), jnp.float32),
                pltpu.VMEM((tile_rows, tile_d), jnp.float32),
            ],
        ),
        compiler_params=pltpu.CompilerParams(
            dimension_semantics=(axis0_sem, pltpu.ARBITRARY, pltpu.ARBITRARY),
            vmem_limit_bytes=vmem_limit,
        ),
    )(inp2, tgt2)

    # Tiny final combine in plain JAX: sum the chunk partials, regroup the
    # folded rows back to samples, then form the dice loss.
    inter = jnp.sum(partials[:, 0, :, 0], axis=0).reshape(n, fold).sum(axis=1)
    s_sum = jnp.sum(partials[:, 1, :, 0], axis=0).reshape(n, fold).sum(axis=1)

    dice = 2.0 * (inter + smooth) / (s_sum + smooth)
    return 1.0 - jnp.sum(dice) / n


def dice_loss_ref(inp, tgt):
    n = inp.shape[0]
    smooth = 1.0
    x = inp.reshape(n, -1).astype(jnp.float32)
    t = tgt.reshape(n, -1).astype(jnp.float32)
    inter = jnp.sum(x * t, axis=1)
    dice = 2.0 * (inter + smooth) / (x.sum(1) + t.sum(1) + smooth)
    return 1.0 - dice.sum() / n


if __name__ == "__main__":
    key = jax.random.PRNGKey(0)
    k1, k2, k3, k4 = jax.random.split(key, 4)

    # Primary case: batch=2, channels=4, spatial=16x16 (NCHW like PyTorch), f32.
    x = jax.nn.sigmoid(jax.random.normal(k1, (2, 4, 16, 16), dtype=jnp.float32))
    t = (jax.random.uniform(k2, (2, 4, 16, 16)) > 0.5).astype(jnp.float32)

    out = jax.block_until_ready(dice_loss(x, t))
    ref = jax.block_until_ready(dice_loss_ref(x, t))
    assert jnp.allclose(out, ref, atol=1e-5, rtol=1e-5), (out, ref)

    # Second case: bf16 input + feature size not a multiple of the lane tile
    # (exercises native-dtype streaming + gated in-kernel tail masking).
    x2 = jax.nn.sigmoid(
        jax.random.normal(k3, (2, 4, 10, 10), dtype=jnp.float32)
    ).astype(jnp.bfloat16)
    t2 = (jax.random.uniform(k4, (2, 4, 10, 10)) > 0.5).astype(jnp.float32)

    out2 = jax.block_until_ready(dice_loss(x2, t2))
    ref2 = jax.block_until_ready(dice_loss_ref(x2, t2))
    assert jnp.allclose(out2, ref2, atol=1e-4, rtol=1e-4), (out2, ref2)

    print("KERNEL_OK")
</pallas_src>

<mosaic_0001>
module attributes {stable_mosaic.version = 11 : i64} {
  func.func @_dice_partial_kernel(%arg0: i32, %arg1: i32, %arg2: i32, %arg3: memref<16x128xf32, #tpu.memory_space<vmem>>, %arg4: memref<16x128xf32, #tpu.memory_space<vmem>>, %arg5: memref<1x2x16x1xf32, #tpu.memory_space<vmem>>, %arg6: memref<16x128xf32, #tpu.memory_space<vmem>>, %arg7: memref<16x128xf32, #tpu.memory_space<vmem>>) attributes {dimension_semantics = [#tpu.dimension_semantics<arbitrary>, #tpu.dimension_semantics<arbitrary>, #tpu.dimension_semantics<arbitrary>], iteration_bounds = array<i64: 1, 1, 1>, scalar_prefetch = 0 : i64, scratch_operands = 2 : i64, tpu.core_type = #tpu.core_type<tc>, window_params = [{transform_indices = @transform_0, window_bounds = array<i64: 16, 128>}, {transform_indices = @transform_1, window_bounds = array<i64: 16, 128>}, {transform_indices = @transform_2, window_bounds = array<i64: 1, 2, 16, 1>}]} {
    %c0_i32 = arith.constant 0 : i32
    %0 = arith.cmpi eq, %arg2, %c0_i32 : i32
    %1 = arith.extui %0 : i1 to i32
    %c0_i32_0 = arith.constant 0 : i32
    %2 = arith.cmpi ne, %1, %c0_i32_0 : i32
    scf.if %2 {
      %cst = arith.constant 0.000000e+00 : f32
      %16 = vector.broadcast %cst : f32 to vector<16x128xf32>
      %c0_14 = arith.constant 0 : index
      %c0_15 = arith.constant 0 : index
      %17 = vector.load %arg6[%c0_14, %c0_15] : memref<16x128xf32, #tpu.memory_space<vmem>>, vector<16x128xf32>
      tpu.vector_store %arg6[%c0_14, %c0_15], %16 {strides = array<i32>} : memref<16x128xf32, #tpu.memory_space<vmem>>, vector<16x128xf32>,
      %cst_16 = arith.constant 0.000000e+00 : f32
      %18 = vector.broadcast %cst_16 : f32 to vector<16x128xf32>
      %c0_17 = arith.constant 0 : index
      %c0_18 = arith.constant 0 : index
      %19 = vector.load %arg7[%c0_17, %c0_18] : memref<16x128xf32, #tpu.memory_space<vmem>>, vector<16x128xf32>
      tpu.vector_store %arg7[%c0_17, %c0_18], %18 {strides = array<i32>} : memref<16x128xf32, #tpu.memory_space<vmem>>, vector<16x128xf32>,
    } else {
    }
    %c0 = arith.constant 0 : index
    %c0_1 = arith.constant 0 : index
    %3 = vector.load %arg3[%c0, %c0_1] : memref<16x128xf32, #tpu.memory_space<vmem>>, vector<16x128xf32>
    %c0_2 = arith.constant 0 : index
    %c0_3 = arith.constant 0 : index
    %4 = vector.load %arg4[%c0_2, %c0_3] : memref<16x128xf32, #tpu.memory_space<vmem>>, vector<16x128xf32>
    %c0_4 = arith.constant 0 : index
    %c0_5 = arith.constant 0 : index
    %5 = vector.load %arg6[%c0_4, %c0_5] : memref<16x128xf32, #tpu.memory_space<vmem>>, vector<16x128xf32>
    %6 = arith.mulf %3, %4 : vector<16x128xf32>
    %7 = arith.addf %5, %6 : vector<16x128xf32>
    %c0_6 = arith.constant 0 : index
    %c0_7 = arith.constant 0 : index
    %8 = vector.load %arg6[%c0_6, %c0_7] : memref<16x128xf32, #tpu.memory_space<vmem>>, vector<16x128xf32>
    tpu.vector_store %arg6[%c0_6, %c0_7], %7 {strides = array<i32>} : memref<16x128xf32, #tpu.memory_space<vmem>>, vector<16x128xf32>,
    %c0_8 = arith.constant 0 : index
    %c0_9 = arith.constant 0 : index
    %9 = vector.load %arg7[%c0_8, %c0_9] : memref<16x128xf32, #tpu.memory_space<vmem>>, vector<16x128xf32>
    %10 = arith.addf %3, %4 : vector<16x128xf32>
    %11 = arith.addf %9, %10 : vector<16x128xf32>
    %c0_10 = arith.constant 0 : index
    %c0_11 = arith.constant 0 : index
    %12 = vector.load %arg7[%c0_10, %c0_11] : memref<16x128xf32, #tpu.memory_space<vmem>>, vector<16x128xf32>
    tpu.vector_store %arg7[%c0_10, %c0_11], %11 {strides = array<i32>} : memref<16x128xf32, #tpu.memory_space<vmem>>, vector<16x128xf32>,
    %c0_i32_12 = arith.constant 0 : i32
    %13 = arith.cmpi eq, %arg2, %c0_i32_12 : i32
    %14 = arith.extui %13 : i1 to i32
    %c0_i32_13 = arith.constant 0 : i32
    %15 = arith.cmpi ne, %14, %c0_i32_13 : i32
    scf.if %15 {
      %c0_14 = arith.constant 0 : index
      %c0_15 = arith.constant 0 : index
      %16 = vector.load %arg6[%c0_14, %c0_15] : memref<16x128xf32, #tpu.memory_space<vmem>>, vector<16x128xf32>
      %cst = arith.constant dense<0.000000e+00> : vector<16xf32>
      %17 = vector.multi_reduction <add>, %16, %cst [1] : vector<16x128xf32> to vector<16xf32>
      %18 = vector.shape_cast %17 : vector<16xf32> to vector<16x1xf32>
      %c0_16 = arith.constant 0 : index
      %c0_17 = arith.constant 0 : index
      %c0_18 = arith.constant 0 : index
      %c0_19 = arith.constant 0 : index
      %19 = vector.load %arg5[%c0_16, %c0_17, %c0_18, %c0_19] : memref<1x2x16x1xf32, #tpu.memory_space<vmem>>, vector<1x1x16x1xf32>
      %20 = vector.shape_cast %19 : vector<1x1x16x1xf32> to vector<16x1xf32>
      %21 = vector.shape_cast %18 : vector<16x1xf32> to vector<1x1x16x1xf32>
      tpu.vector_store %arg5[%c0_16, %c0_17, %c0_18, %c0_19], %21 {strides = array<i32>} : memref<1x2x16x1xf32, #tpu.memory_space<vmem>>, vector<1x1x16x1xf32>,
      %c0_20 = arith.constant 0 : index
      %c0_21 = arith.constant 0 : index
      %22 = vector.load %arg7[%c0_20, %c0_21] : memref<16x128xf32, #tpu.memory_space<vmem>>, vector<16x128xf32>
      %cst_22 = arith.constant dense<0.000000e+00> : vector<16xf32>
      %23 = vector.multi_reduction <add>, %22, %cst_22 [1] : vector<16x128xf32> to vector<16xf32>
      %24 = vector.shape_cast %23 : vector<16xf32> to vector<16x1xf32>
      %c0_23 = arith.constant 0 : index
      %c1 = arith.constant 1 : index
      %c0_24 = arith.constant 0 : index
      %c0_25 = arith.constant 0 : index
      %25 = vector.load %arg5[%c0_23, %c1, %c0_24, %c0_25] : memref<1x2x16x1xf32, #tpu.memory_space<vmem>>, vector<1x1x16x1xf32>
      %26 = vector.shape_cast %25 : vector<1x1x16x1xf32> to vector<16x1xf32>
      %27 = vector.shape_cast %24 : vector<16x1xf32> to vector<1x1x16x1xf32>
      tpu.vector_store %arg5[%c0_23, %c1, %c0_24, %c0_25], %27 {strides = array<i32>} : memref<1x2x16x1xf32, #tpu.memory_space<vmem>>, vector<1x1x16x1xf32>,
    } else {
    }
    return
  }
  func.func @transform_0(%arg0: i32, %arg1: i32, %arg2: i32) -> (i32, i32) {
    %c1_i32 = arith.constant 1 : i32
    %0 = arith.muli %arg0, %c1_i32 : i32
    %1 = arith.addi %0, %arg2 : i32
    %c0_i32 = arith.constant 0 : i32
    return %arg1, %1 : i32, i32
  }
  func.func @transform_1(%arg0: i32, %arg1: i32, %arg2: i32) -> (i32, i32) {
    %c1_i32 = arith.constant 1 : i32
    %0 = arith.muli %arg0, %c1_i32 : i32
    %1 = arith.addi %0, %arg2 : i32
    %c0_i32 = arith.constant 0 : i32
    return %arg1, %1 : i32, i32
  }
  func.func @transform_2(%arg0: i32, %arg1: i32, %arg2: i32) -> (i32, i32, i32, i32) {
    %c0_i32 = arith.constant 0 : i32
    %c0_i32_0 = arith.constant 0 : i32
    %c0_i32_1 = arith.constant 0 : i32
    return %arg0, %c0_i32, %arg1, %c0_i32_0 : i32, i32, i32, i32
  }
}

</mosaic_0001>

<bundles_post_ra>
// kernel: tpu_custom_call.1
= control target key start
LH: loop header
LB: loop body
LE: loop exit
PB: predicated region body
PF: predicated region fallthrough
CT: control target
= control target key end

     0   :  { %7 = vsyncpa [#allocation5], 0  ;;  %s211_s0 = inlined_call_operand.hbm [shape: f32[16,128], index: 0, kind: input, shape index: {}]   ;;  %s212_s1 = inlined_call_operand.hbm [shape: f32[16,128], index: 1, kind: input, shape index: {}]   ;;  %s213_s2 = inlined_call_operand.vmem [shape: f32[1,2,16,1], index: 2, kind: output, shape index: {}]  }
   0x1   :  { %8 = vsyncpa [#allocation7], 0  ;;  %s156_s9 = smov [#allocation4]   ;;  %s108_s13 = scalar_lea.hbm %s211_s0, 256 }
   0x2   :  { %s17_s10 = sshll.u32 %s156_s9, 4  ;;  %p109_p0 = scmp.ne.s32.totalorder %s211_s0, %s108_s13  ;;  %s18_s10 = int_to_ptr.vmem [resolvable:$true] %s17_s10 }
   0x3   :  { %p112_p1 = scmp.lt.u32.totalorder %s108_s13, %s211_s0 }
   0x5   :  { %p114_p2 = pnand %p112_p1, %p109_p0 }
   0x7   :  { %117 = shalt.err (!%p114_p2)
}
   0x8   :  { %s118_s18 = scalar_lea.vmem %s18_s10, 256  ;;  %p123_p4 = scmp.lt.s32.totalorder %s18_s10, %s18_s10 }
   0x9   :  { %p119_p3 = scmp.ne.s32.totalorder %s18_s10, %s118_s18  ;;  %p124_p5 = scmp.lt.s32.totalorder %s118_s18, %s118_s18 }
   0xb   :  { %p125_p6 = por %p124_p5, %p123_p4 }
   0xd   :  { %p126_p7 = pnand %p125_p6, %p119_p3 }
   0xf   :  { %129 = shalt.err (!%p126_p7)
}
  0x10   :  { %s157_s19 = smov 128   ;;  %s158_s20 = smov 8  }
  0x11   :  { %23 = dma.hbm_to_vmem [thread:$0]  %s211_s0, 256, %s18_s10, [#allocation5], %s157_s19, %s157_s19, %s158_s20  }
  0x12   :  { %s159_s23 = smov [#allocation6]   ;;  %s130_s27 = scalar_lea.hbm %s212_s1, 256 }
  0x13   :  { %s32_s24 = sshll.u32 %s159_s23, 4  ;;  %p131_p8 = scmp.ne.s32.totalorder %s212_s1, %s130_s27  ;;  %s33_s24 = int_to_ptr.vmem [resolvable:$true] %s32_s24 }
  0x14   :  { %p134_p9 = scmp.lt.u32.totalorder %s130_s27, %s212_s1 }
  0x16   :  { %p136_p10 = pnand %p134_p9, %p131_p8 }
  0x18   :  { %139 = shalt.err (!%p136_p10)
}
  0x19   :  { %s140_s4 = scalar_lea.vmem %s33_s24, 256  ;;  %p145_p12 = scmp.lt.s32.totalorder %s33_s24, %s33_s24 }
  0x1a   :  { %p141_p11 = scmp.ne.s32.totalorder %s33_s24, %s140_s4  ;;  %p146_p13 = scmp.lt.s32.totalorder %s140_s4, %s140_s4 }
  0x1c   :  { %p147_p0 = por %p146_p13, %p145_p12 }
  0x1e   :  { %p148_p1 = pnand %p147_p0, %p141_p11 }
  0x20   :  { %151 = shalt.err (!%p148_p1)
}
  0x21   :  { %38 = dma.hbm_to_vmem [thread:$0]  %s212_s1, 256, %s33_s24, [#allocation7], %s157_s19, %s157_s19, %s158_s20  }
  0x22   :  { %152 = dma.done.wait [#allocation5], 256  }
  0x23   :  { %153 = vsyncadd [#allocation5], 4294967040 }
  0x24   :  { %154 = dma.done.wait [#allocation7], 256  }
  0x25   :  { %155 = vsyncadd [#allocation7], 4294967040  ;;  %v55_v0 = vld [vmem:[#allocation4] sm:$0xff]  ;;  %v57_v1 = vld [vmem:[#allocation6] sm:$0xff]  ;;  %vm84_vm0 = vcmask 7168  }
  0x26   :  { %v56_v2 = vld [vmem:[#allocation4 + $0x8] sm:$0xff]  ;;  %v69_v3 = vadd.f32 %v57_v1, %v55_v0  ;;  %v61_v4 = vmul.f32 %v57_v1, %v55_v0  ;;  %v58_v5 = vld [vmem:[#allocation6 + $0x8] sm:$0xff] }
  0x27   :  { %v70_v6 = vadd.f32 %v58_v5, %v56_v2  ;;  %v62_v7 = vmul.f32 %v58_v5, %v56_v2 }
  0x28   :  { %89 = vadd.xlane.f32.xlu1 %v69_v3  ;;  %80 = vadd.xlane.f32.xlu0 %v61_v4 }
  0x2c   :  { %91 = vadd.xlane.f32.xlu1 %v70_v6  ;;  %82 = vadd.xlane.f32.xlu0 %v62_v7 }
  0xb5   :  { %v90_v8 = vpop.xlane.xlu1 %89  ;;  %v81_v9 = vpop.xlane.xlu0 %80 }
  0xb6   :  { %102 = vst.msk [vmem:[%s213_s2 + $0x10] sm:$0xff] %vm84_vm0, %v90_v8  ;;  %85 = vst.msk [vmem:[%s213_s2] sm:$0xff] %vm84_vm0, %v81_v9 }
  0xb9   :  { %v92_v10 = vpop.xlane.xlu1 %91  ;;  %v83_v11 = vpop.xlane.xlu0 %82 }
  0xba   :  { %103 = vst.msk [vmem:[%s213_s2 + $0x18] sm:$0xff] %vm84_vm0, %v92_v10  ;;  %86 = vst.msk [vmem:[%s213_s2 + $0x8] sm:$0xff] %vm84_vm0, %v83_v11 }
  0xbb   :  { %100 = vsyncpa [#allocation5], 1 }
  0xbc   :  { %101 = vsyncpa [#allocation7], 1 }

</bundles_post_ra>
